<compile_context>
chip_gen: v7x
topology: tpu7x:2x2x1
jax: 0.10.0
libtpu: 0.0.40
codegen_flags: <defaults>
</compile_context>

<pallas_src>
import functools

import jax
import jax.numpy as jnp
from jax.experimental import pallas as pl
from jax.experimental.pallas import tpu as pltpu

_LANE = 128
_SUBLANE = 8
_COL_CAP = 16384          # max lane-dim tile (64 KiB of f32 per row)
_TARGET_TILE_BYTES = 1 << 20   # ~1 MiB per input tile


def _loss_kernel(x_ref, y_ref, w_ref, out_ref, acc_ref):
    """Weighted |x-y| accumulation into a tile-shaped VMEM scratch.

    Grid: (split, row_steps, col_steps). Output block depends only on `split`,
    so the accumulator is initialized at (i==0, j==0) and reduced/stored once at
    the last (i, j) of each split.
    """
    i = pl.program_id(1)
    j = pl.program_id(2)

    @pl.when((i == 0) & (j == 0))
    def _():
        acc_ref[...] = jnp.zeros_like(acc_ref)

    x = x_ref[...].astype(jnp.float32)
    y = y_ref[...].astype(jnp.float32)
    w = w_ref[...].astype(jnp.float32)          # (1, TCOL) -> broadcast over rows
    acc_ref[...] += jnp.abs(x - y) * w          # pure VPU work, no per-step XLU

    @pl.when((i == pl.num_programs(1) - 1) & (j == pl.num_programs(2) - 1))
    def _():
        out_ref[0, 0] = jnp.sum(acc_ref[...])   # single XLU reduce per split


def _coverage_counts(length, block_size, stride):
    """Number of unfold windows covering each index along one spatial axis."""
    n = (length - block_size) // stride + 1
    idx = jnp.arange(length)
    i_hi = jnp.minimum(idx // stride, n - 1)
    # ceil((idx - block_size + 1) / stride), clamped at 0
    i_lo = jnp.maximum(-((-(idx - block_size + 1)) // stride), 0)
    return jnp.maximum(i_hi - i_lo + 1, 0).astype(jnp.float32), n


def _round_up(v, m):
    return -(-v // m) * m


@functools.partial(jax.jit, static_argnames=("block_size", "stride"))
def local_similarity_loss(x, y, *, block_size, stride):
    N, C, H, W = x.shape
    assert y.shape == x.shape

    cov_h, n_h = _coverage_counts(H, block_size, stride)
    cov_w, n_w = _coverage_counts(W, block_size, stride)
    assert n_h >= 1 and n_w >= 1, "block_size must fit within the spatial dims"
    weight = (cov_h[:, None] * cov_w[None, :]).reshape(1, H * W)  # (1, H*W)

    B = N * C
    HW = H * W
    xf = x.reshape(B, HW)
    yf = y.reshape(B, HW)

    # ---- lane-dense column layout ------------------------------------------
    HWp = _round_up(HW, _LANE)
    if HWp <= _COL_CAP:
        TCOL = HWp
    else:
        TCOL = _COL_CAP
        HWp = _round_up(HWp, TCOL)
    col_steps = HWp // TCOL

    # ---- row tiling (~1 MiB per input tile, multiple of 8 sublanes) ---------
    TB = max(_SUBLANE, (_TARGET_TILE_BYTES // (TCOL * 4)) // _SUBLANE * _SUBLANE)
    TB = min(TB, _round_up(B, _SUBLANE))

    row_tiles = -(-B // TB)
    nsplit = 2 if row_tiles >= 2 else 1      # megacore sharding on v7x
    row_steps = -(-row_tiles // nsplit)
    Bp = nsplit * row_steps * TB

    # Zero padding is exact: |0-0| * w == 0 and padded weight lanes are 0.
    if Bp != B or HWp != HW:
        pad_xy = ((0, Bp - B), (0, HWp - HW))
        xf = jnp.pad(xf, pad_xy)
        yf = jnp.pad(yf, pad_xy)
    if HWp != HW:
        weight = jnp.pad(weight, ((0, 0), (0, HWp - HW)))

    partials = pl.pallas_call(
        _loss_kernel,
        out_shape=jax.ShapeDtypeStruct((nsplit, 1), jnp.float32),
        grid_spec=pltpu.PrefetchScalarGridSpec(
            num_scalar_prefetch=0,
            grid=(nsplit, row_steps, col_steps),
            in_specs=[
                pl.BlockSpec((TB, TCOL), lambda s, i, j: (s * row_steps + i, j)),
                pl.BlockSpec((TB, TCOL), lambda s, i, j: (s * row_steps + i, j)),
                pl.BlockSpec((1, TCOL), lambda s, i, j: (0, j)),
            ],
            out_specs=pl.BlockSpec(
                (1, 1), lambda s, i, j: (s, 0), memory_space=pltpu.SMEM
            ),
            scratch_shapes=[pltpu.VMEM((TB, TCOL), jnp.float32)],
        ),
        compiler_params=pltpu.CompilerParams(
            dimension_semantics=("parallel", "arbitrary", "arbitrary"),
        ),
    )(xf, yf, weight)

    denom = jnp.float32(N * C * n_h * n_w * block_size * block_size)
    return jnp.sum(partials) / denom


def _reference_loss(x, y, block_size, stride):
    """Pure-JAX reference mirroring the PyTorch unfold semantics."""
    N, C, H, W = x.shape
    n_h = (H - block_size) // stride + 1
    n_w = (W - block_size) // stride + 1
    hs = jnp.arange(n_h) * stride
    ws = jnp.arange(n_w) * stride

    def patches(a):
        rows = hs[:, None] + jnp.arange(block_size)[None, :]   # (nH, bs)
        cols = ws[:, None] + jnp.arange(block_size)[None, :]   # (nW, bs)
        p = a[:, :, rows, :]                                   # (N, C, nH, bs, W)
        p = p[:, :, :, :, cols]                                # (N, C, nH, bs, nW, bs)
        return jnp.transpose(p, (0, 1, 2, 4, 3, 5))

    return jnp.mean(jnp.abs(patches(x) - patches(y)))


if __name__ == "__main__":
    key = jax.random.PRNGKey(0)
    kx, ky = jax.random.split(key)

    N, C, H, W = 2, 4, 16, 16
    block_size, stride = 4, 2

    x = jax.random.normal(kx, (N, C, H, W), dtype=jnp.float32)
    y = jax.random.normal(ky, (N, C, H, W), dtype=jnp.float32)

    loss = local_similarity_loss(x, y, block_size=block_size, stride=stride)
    loss = jax.block_until_ready(loss)

    ref = _reference_loss(x, y, block_size, stride)
    assert jnp.allclose(loss, ref, rtol=1e-5, atol=1e-5), (loss, ref)

    # Second config: non-divisible spatial size / uncovered trailing pixels.
    H2, W2 = 13, 11
    x2 = jax.random.normal(kx, (N, C, H2, W2), dtype=jnp.float32)
    y2 = jax.random.normal(ky, (N, C, H2, W2), dtype=jnp.float32)
    loss2 = jax.block_until_ready(
        local_similarity_loss(x2, y2, block_size=3, stride=2)
    )
    ref2 = _reference_loss(x2, y2, 3, 2)
    assert jnp.allclose(loss2, ref2, rtol=1e-5, atol=1e-5), (loss2, ref2)

    print("KERNEL_OK")
</pallas_src>

<mosaic_0001>
module attributes {stable_mosaic.version = 11 : i64} {
  func.func @_loss_kernel(%arg0: i32, %arg1: i32, %arg2: i32, %arg3: memref<8x256xf32, #tpu.memory_space<vmem>>, %arg4: memref<8x256xf32, #tpu.memory_space<vmem>>, %arg5: memref<1x256xf32, #tpu.memory_space<vmem>>, %arg6: memref<1x1xf32, #tpu.memory_space<smem>>, %arg7: memref<8x256xf32, #tpu.memory_space<vmem>>) attributes {dimension_semantics = [#tpu.dimension_semantics<parallel>, #tpu.dimension_semantics<arbitrary>, #tpu.dimension_semantics<arbitrary>], iteration_bounds = array<i64: 1, 1, 1>, scalar_prefetch = 0 : i64, scratch_operands = 1 : i64, tpu.core_type = #tpu.core_type<tc>, window_params = [{transform_indices = @transform_0, window_bounds = array<i64: 8, 256>}, {transform_indices = @transform_1, window_bounds = array<i64: 8, 256>}, {transform_indices = @transform_2, window_bounds = array<i64: 1, 256>}, {transform_indices = @transform_3, window_bounds = array<i64: 1, 1>}]} {
    %c0_i32 = arith.constant 0 : i32
    %0 = arith.cmpi eq, %arg1, %c0_i32 : i32
    %c0_i32_0 = arith.constant 0 : i32
    %1 = arith.cmpi eq, %arg2, %c0_i32_0 : i32
    %2 = arith.andi %0, %1 : i1
    %3 = arith.extui %2 : i1 to i32
    %c0_i32_1 = arith.constant 0 : i32
    %4 = arith.cmpi ne, %3, %c0_i32_1 : i32
    scf.if %4 {
      %cst = arith.constant 0.000000e+00 : f32
      %20 = vector.broadcast %cst : f32 to vector<8x256xf32>
      %c0_14 = arith.constant 0 : index
      %c0_15 = arith.constant 0 : index
      %21 = vector.load %arg7[%c0_14, %c0_15] : memref<8x256xf32, #tpu.memory_space<vmem>>, vector<8x256xf32>
      tpu.vector_store %arg7[%c0_14, %c0_15], %20 {strides = array<i32>} : memref<8x256xf32, #tpu.memory_space<vmem>>, vector<8x256xf32>,
    } else {
    }
    %c0 = arith.constant 0 : index
    %c0_2 = arith.constant 0 : index
    %5 = vector.load %arg3[%c0, %c0_2] : memref<8x256xf32, #tpu.memory_space<vmem>>, vector<8x256xf32>
    %c0_3 = arith.constant 0 : index
    %c0_4 = arith.constant 0 : index
    %6 = vector.load %arg4[%c0_3, %c0_4] : memref<8x256xf32, #tpu.memory_space<vmem>>, vector<8x256xf32>
    %c0_5 = arith.constant 0 : index
    %c0_6 = arith.constant 0 : index
    %7 = vector.load %arg5[%c0_5, %c0_6] : memref<1x256xf32, #tpu.memory_space<vmem>>, vector<1x256xf32>
    %c0_7 = arith.constant 0 : index
    %c0_8 = arith.constant 0 : index
    %8 = vector.load %arg7[%c0_7, %c0_8] : memref<8x256xf32, #tpu.memory_space<vmem>>, vector<8x256xf32>
    %9 = arith.subf %5, %6 : vector<8x256xf32>
    %10 = math.absf %9 : vector<8x256xf32>
    %11 = vector.broadcast %7 : vector<1x256xf32> to vector<8x256xf32>
    %12 = arith.mulf %10, %11 : vector<8x256xf32>
    %13 = arith.addf %8, %12 : vector<8x256xf32>
    %c0_9 = arith.constant 0 : index
    %c0_10 = arith.constant 0 : index
    %14 = vector.load %arg7[%c0_9, %c0_10] : memref<8x256xf32, #tpu.memory_space<vmem>>, vector<8x256xf32>
    tpu.vector_store %arg7[%c0_9, %c0_10], %13 {strides = array<i32>} : memref<8x256xf32, #tpu.memory_space<vmem>>, vector<8x256xf32>,
    %c0_i32_11 = arith.constant 0 : i32
    %15 = arith.cmpi eq, %arg1, %c0_i32_11 : i32
    %c0_i32_12 = arith.constant 0 : i32
    %16 = arith.cmpi eq, %arg2, %c0_i32_12 : i32
    %17 = arith.andi %15, %16 : i1
    %18 = arith.extui %17 : i1 to i32
    %c0_i32_13 = arith.constant 0 : i32
    %19 = arith.cmpi ne, %18, %c0_i32_13 : i32
    scf.if %19 {
      %c0_14 = arith.constant 0 : index
      %c0_15 = arith.constant 0 : index
      %20 = vector.load %arg7[%c0_14, %c0_15] : memref<8x256xf32, #tpu.memory_space<vmem>>, vector<8x256xf32>
      %21 = vector.shape_cast %20 : vector<8x256xf32> to vector<1x8x256xf32>
      %cst = arith.constant dense<0.000000e+00> : vector<1xf32>
      %22 = vector.multi_reduction <add>, %21, %cst [1, 2] : vector<1x8x256xf32> to vector<1xf32>
      %23 = vector.shape_cast %22 : vector<1xf32> to vector<1x1x1xf32>
      %24 = vector.extract %23[0, 0, 0] : f32 from vector<1x1x1xf32>
      %c0_16 = arith.constant 0 : index
      %c0_17 = arith.constant 0 : index
      %25 = memref.load %arg6[%c0_16, %c0_17] : memref<1x1xf32, #tpu.memory_space<smem>>
      memref.store %24, %arg6[%c0_16, %c0_17] : memref<1x1xf32, #tpu.memory_space<smem>>
    } else {
    }
    return
  }
  func.func @transform_0(%arg0: i32, %arg1: i32, %arg2: i32) -> (i32, i32) {
    %c1_i32 = arith.constant 1 : i32
    %0 = arith.muli %arg0, %c1_i32 : i32
    %1 = arith.addi %0, %arg1 : i32
    %c0_i32 = arith.constant 0 : i32
    return %1, %arg2 : i32, i32
  }
  func.func @transform_1(%arg0: i32, %arg1: i32, %arg2: i32) -> (i32, i32) {
    %c1_i32 = arith.constant 1 : i32
    %0 = arith.muli %arg0, %c1_i32 : i32
    %1 = arith.addi %0, %arg1 : i32
    %c0_i32 = arith.constant 0 : i32
    return %1, %arg2 : i32, i32
  }
  func.func @transform_2(%arg0: i32, %arg1: i32, %arg2: i32) -> (i32, i32) {
    %c0_i32 = arith.constant 0 : i32
    %c0_i32_0 = arith.constant 0 : i32
    return %c0_i32, %arg2 : i32, i32
  }
  func.func @transform_3(%arg0: i32, %arg1: i32, %arg2: i32) -> (i32, i32) {
    %c0_i32 = arith.constant 0 : i32
    %c0_i32_0 = arith.constant 0 : i32
    return %arg0, %c0_i32 : i32, i32
  }
}

</mosaic_0001>

<bundles_post_ra>
// kernel: local_similarity_loss.1
= control target key start
LH: loop header
LB: loop body
LE: loop exit
PB: predicated region body
PF: predicated region fallthrough
CT: control target
= control target key end

     0   :  { %v75_v3 = vlaneseq  ;;  %s195_s0 = inlined_call_operand.vmem [shape: f32[8,256], index: 0, kind: input, shape index: {}]   ;;  %s196_s1 = inlined_call_operand.vmem [shape: f32[8,256], index: 1, kind: input, shape index: {}]   ;;  %s197_s2 = inlined_call_operand.vmem [shape: f32[1,256], index: 2, kind: input, shape index: {}]   ;;  %s198_s3 = inlined_call_operand.hbm [shape: f32[1,1], index: 3, kind: output, shape index: {}]  }
   0x1   :  { %v63_v0 = vld [vmem:[%s195_s0] sm:$0xff]  ;;  %v64_v1 = vld [vmem:[%s195_s0 + $0x8] sm:$0xff] }
   0x2   :  { %v65_v2 = vld [vmem:[%s196_s1] sm:$0xff]  ;;  %v66_v4 = vld [vmem:[%s196_s1 + $0x8] sm:$0xff] }
   0x3   :  { %v70_v5 = vsub.f32 %v63_v0, %v65_v2 }
   0x4   :  { %8 = vsyncpa [#allocation4], 0  ;;  %v71_v6 = vsub.f32 %v64_v1, %v66_v4  ;;  %v76_v7 = vshrl.u32 %v75_v3, 7  ;;  %v67_v8 = vld [vmem:[%s197_s2] sm:$0x3]  ;;  %s135_s22 = scalar_lea.hbm %s198_s3, 16 }
   0x5   :  { %v72_v9 = vand.u32 2147483647, %v70_v5  ;;  %p136_p0 = scmp.ne.s32.totalorder %s198_s3, %s135_s22  ;;  %p139_p1 = scmp.lt.u32.totalorder %s135_s22, %s198_s3 }
   0x6   :  { %v73_v10 = vand.u32 2147483647, %v71_v6  ;;  %v77_v11 = vsub.s32 0, %v76_v7  ;;  %v81_v12 = vsub.s32 1, %v76_v7 }
   0x7   :  { %p141_p2 = pnand %p139_p1, %p136_p0 }
   0x8   :  { %v78_v13 = vrot.slane %v67_v8, %v77_v11  ;;  %v82_v14 = vrot.slane %v67_v8, %v81_v12 }
   0xa   :  { %v85_v15 = vmul.f32 %v78_v13, %v72_v9  ;;  %v86_v16 = vmul.f32 %v82_v14, %v73_v10 }
   0xc   :  { %v95_v17 = vadd.f32 %v86_v16, %v85_v15 }
   0xe   :  { %96 = vadd.xlane.f32.xlu0 %v95_v17 }
  0x9b   :  { %v97_v18 = vpop.xlane.xlu0 %96 }
  0x9c   :  { %v98_v19 = vrot.slane %v97_v18, 4 }
  0x9e   :  { %v99_v20 = vadd.f32 %v98_v19, %v97_v18 }
  0xa0   :  { %v100_v21 = vrot.slane %v99_v20, 2 }
  0xa2   :  { %v101_v22 = vadd.f32 %v100_v21, %v99_v20 }
  0xa4   :  { %v102_v23 = vrot.slane %v101_v22, 1 }
  0xa6   :  { %v103_v24 = vadd.f32 %v102_v23, %v101_v22 }
  0xa8   :  { %132 = vpush %v103_v24 }
  0xd9   :  { %s133_s0 = spop %132 }
  0xda   :  { %106 = sst [smem:[#allocation3]] %s133_s0 }
  0xdb   :  { %144 = shalt.err (!%p141_p2)
}
  0xdc   :  { %s147_s27 = smov [#allocation3]  }
  0xdd   :  { %114 = dma.smem_to_hbm %s147_s27, 16, %s198_s3, [#allocation4]  }
  0xde   :  { %145 = dma.done.wait [#allocation4], 16  }
  0xdf   :  { %146 = vsyncadd [#allocation4], 4294967280 }
  0xe0   :  { %118 = sfence }
  0xe1   :  { %119 = vsyncpa [#allocation4], 1 }

</bundles_post_ra>
